<compile_context>
chip_gen: v5e
topology: v5e:2x2
jax: 0.10.0
libtpu: 0.0.40
codegen_flags: <defaults>
</compile_context>

<pallas_src>
import functools

import jax
import jax.numpy as jnp
from jax.experimental import pallas as pl
from jax.experimental.pallas import tpu as pltpu

_MB = 1024 * 1024


def _round_up(x, m):
    return ((x + m - 1) // m) * m


def _vmem_capacity_bytes():
    try:
        info = pltpu.get_tpu_info()
        cap = getattr(info, "vmem_capacity_bytes", None)
        if cap:
            return int(cap)
    except Exception:
        pass
    return 64 * _MB  # conservative default: v7x has 64 MiB per TensorCore


# ----------------------------------------------------------------------------
# Fused all-layers kernel (small graphs): everything VMEM-resident.
# ----------------------------------------------------------------------------
def _fused_gcn_kernel(a_ref, h_ref, w_ref, b_ref, o_ref, *, num_layers):
    a = a_ref[...]                                  # (n_pad, n_pad) bf16
    h = h_ref[...].astype(jnp.float32)              # (n_pad, Fp)    f32
    for li in range(num_layers):
        w = w_ref[li]                               # (Fp, Fp) bf16
        xw = jnp.dot(h.astype(jnp.bfloat16), w,
                     preferred_element_type=jnp.float32)
        h = jnp.dot(a, xw.astype(jnp.bfloat16),
                    preferred_element_type=jnp.float32) + b_ref[li]
        if li != num_layers - 1:
            h = jnp.maximum(h, 0.0)
    o_ref[...] = h


def fused_gcn_forward(a_hat, h0, w_all, b_all, *, num_layers, vmem_limit):
    n_pad, fp = h0.shape
    kernel = functools.partial(_fused_gcn_kernel, num_layers=num_layers)
    return pl.pallas_call(
        kernel,
        out_shape=jax.ShapeDtypeStruct((n_pad, fp), jnp.float32),
        grid=(1,),
        in_specs=[
            pl.BlockSpec((n_pad, n_pad), lambda i: (0, 0)),          # A_hat
            pl.BlockSpec((n_pad, fp), lambda i: (0, 0)),             # H0
            pl.BlockSpec((num_layers, fp, fp), lambda i: (0, 0, 0)),  # W stack
            pl.BlockSpec((num_layers, 1, fp), lambda i: (0, 0, 0)),   # biases
        ],
        out_specs=pl.BlockSpec((n_pad, fp), lambda i: (0, 0)),
        compiler_params=pltpu.CompilerParams(
            dimension_semantics=("arbitrary",),
            vmem_limit_bytes=vmem_limit),
        cost_estimate=pl.CostEstimate(
            flops=2 * num_layers * (n_pad * fp * fp + n_pad * n_pad * fp),
            transcendentals=0,
            bytes_accessed=2 * n_pad * n_pad + 2 * n_pad * fp
                           + 2 * num_layers * fp * fp + 4 * n_pad * fp),
    )(a_hat, h0, w_all, b_all)


# ----------------------------------------------------------------------------
# Tiled per-layer kernel (large graphs):
#   OUT = A_hat @ (H @ W) + b  (+ ReLU),  X@W fused, H/W/bias VMEM-resident,
#   f32 VMEM accumulator, K (reduction) axis innermost.
# ----------------------------------------------------------------------------
def _gcn_layer_kernel(a_ref, h_ref, w_ref, b_ref, o_ref, acc_ref, *,
                      tk, apply_relu):
    k = pl.program_id(1)

    @pl.when(k == 0)
    def _():
        acc_ref[...] = jnp.zeros_like(acc_ref)

    k0 = pl.multiple_of(k * tk, tk)
    h_k = h_ref[pl.ds(k0, tk), :]                   # (tk, f_in_pad) bf16
    xw_k = jnp.dot(h_k, w_ref[...],
                   preferred_element_type=jnp.float32).astype(jnp.bfloat16)
    acc_ref[...] += jnp.dot(a_ref[...], xw_k,
                            preferred_element_type=jnp.float32)

    @pl.when(k == pl.num_programs(1) - 1)
    def _():
        out = acc_ref[...] + b_ref[...]             # (1, Fout) broadcasts
        if apply_relu:
            out = jnp.maximum(out, 0.0)
        o_ref[...] = out.astype(o_ref.dtype)


def gcn_layer_tiled(a_hat, h, w_p, b_p, *, tm, tk, apply_relu, out_dtype,
                    vmem_limit):
    n_pad = a_hat.shape[0]
    f_in_pad = h.shape[1]
    f_out_pad = w_p.shape[1]
    kernel = functools.partial(_gcn_layer_kernel, tk=tk, apply_relu=apply_relu)
    out_bytes = n_pad * f_out_pad * jnp.dtype(out_dtype).itemsize
    return pl.pallas_call(
        kernel,
        out_shape=jax.ShapeDtypeStruct((n_pad, f_out_pad), out_dtype),
        grid=(n_pad // tm, n_pad // tk),             # reduction axis last
        in_specs=[
            pl.BlockSpec((tm, tk), lambda i, k: (i, k)),              # A_hat
            pl.BlockSpec((n_pad, f_in_pad), lambda i, k: (0, 0)),     # H res.
            pl.BlockSpec((f_in_pad, f_out_pad), lambda i, k: (0, 0)),  # W res.
            pl.BlockSpec((1, f_out_pad), lambda i, k: (0, 0)),        # bias
        ],
        out_specs=pl.BlockSpec((tm, f_out_pad), lambda i, k: (i, 0)),
        scratch_shapes=[pltpu.VMEM((tm, f_out_pad), jnp.float32)],
        compiler_params=pltpu.CompilerParams(
            dimension_semantics=("parallel", "arbitrary"),
            vmem_limit_bytes=vmem_limit),
        cost_estimate=pl.CostEstimate(
            flops=2 * n_pad * n_pad * f_out_pad
                  + 2 * (n_pad // tm) * n_pad * f_in_pad * f_out_pad,
            transcendentals=0,
            bytes_accessed=2 * n_pad * n_pad + 2 * n_pad * f_in_pad
                           + 2 * f_in_pad * f_out_pad + 4 * f_out_pad
                           + out_bytes),
    )(a_hat, h, w_p, b_p)


# ----------------------------------------------------------------------------
# Tile / VMEM planning (generation aware)
# ----------------------------------------------------------------------------
def _plan_tiles_tiled(n, f_in_pad, f_out_pad):
    vmem_cap = _vmem_capacity_bytes()
    # Cap double-buffered footprint well under the per-core VMEM:
    # v7x: 64 MiB/TC, v5e/v6e: 128 MiB; keep headroom for compiler scratch.
    budget = max(20 * _MB, min(vmem_cap - 24 * _MB, 80 * _MB))
    n_pad = _round_up(max(n, 8), 512 if n > 512 else 128)

    best = None
    for tm in (1024, 512, 256, 128):
        if n_pad % tm:
            continue
        for tk in (4096, 2048, 1024, 512, 256, 128):
            if n_pad % tk:
                continue
            fp = (2 * tm * tk * 2                 # A_hat tile, dbl-buffered
                  + 2 * n_pad * f_in_pad * 2      # resident H (conservative)
                  + 2 * f_in_pad * f_out_pad * 2  # resident W
                  + 2 * tm * f_out_pad * 4        # output tile (f32 worst)
                  + tm * f_out_pad * 4)           # accumulator scratch
            if fp <= budget:
                best = (tm, tk, fp)
                break
        if best is not None:
            break
    if best is None:
        # TODO(synk): block-sparse A_hat / streamed H for graphs this large.
        tm = 128
        tk = 512 if n_pad % 512 == 0 else 128
        best = (tm, tk, budget)

    tm, tk, fp = best
    vmem_limit = int(min(vmem_cap - 8 * _MB, max(48 * _MB, fp + 16 * _MB)))
    return n_pad, tm, tk, vmem_limit


def _fused_path_fits(n_pad, fp, num_layers):
    need = (n_pad * n_pad * 2            # A_hat bf16
            + num_layers * fp * fp * 2   # weight stack
            + n_pad * fp * 2             # H0
            + n_pad * fp * 4             # output
            + 6 * n_pad * fp * 4)        # slack for in-kernel f32 temporaries
    return need <= 12 * _MB


# ----------------------------------------------------------------------------
# Dense symmetric-normalized adjacency (PyG GCNConv gcn_norm semantics)
# ----------------------------------------------------------------------------
def build_norm_adj(edge_index, num_nodes, edge_weight=None):
    src = edge_index[0]
    dst = edge_index[1]
    if edge_weight is None:
        edge_weight = jnp.ones(src.shape[0], dtype=jnp.float32)
    loop = jnp.arange(num_nodes, dtype=src.dtype)
    src = jnp.concatenate([src, loop])
    dst = jnp.concatenate([dst, loop])
    ew = jnp.concatenate([edge_weight, jnp.ones(num_nodes, jnp.float32)])
    deg = jnp.zeros((num_nodes,), jnp.float32).at[dst].add(ew)
    dinv = jnp.where(deg > 0, 1.0 / jnp.sqrt(deg), 0.0)
    norm = dinv[src] * ew * dinv[dst]
    # A_hat[target, source] so A_hat @ X aggregates messages at targets.
    a_hat = jnp.zeros((num_nodes, num_nodes), jnp.float32).at[dst, src].add(norm)
    return a_hat


def build_norm_adj_padded(edge_index, num_nodes, n_pad, edge_weight=None):
    a = build_norm_adj(edge_index, num_nodes, edge_weight)
    a_p = jnp.zeros((n_pad, n_pad), jnp.bfloat16)
    return a_p.at[:num_nodes, :num_nodes].set(a.astype(jnp.bfloat16))


# ----------------------------------------------------------------------------
# GCN_gen: parameter init + forward
# ----------------------------------------------------------------------------
def init_gcn_gen_params(key, in_channels, hidden_channels, out_channels,
                        num_layers):
    dims = [in_channels] + [hidden_channels] * (num_layers - 1) + [out_channels]
    params = []
    for i in range(num_layers):
        f_in, f_out = dims[i], dims[i + 1]
        key, wk = jax.random.split(key)
        limit = jnp.sqrt(6.0 / (f_in + f_out))   # glorot-uniform like GCNConv
        w = jax.random.uniform(wk, (f_in, f_out), jnp.float32, -limit, limit)
        b = jnp.zeros((f_out,), jnp.float32)
        params.append((w, b))
    return params


def gcn_gen_forward(params, x, edge_index, edge_weight=None, *,
                    force_tiled=False):
    n, f_in = x.shape
    num_layers = len(params)
    out_channels = params[-1][0].shape[1]
    f_max_pad = _round_up(max([f_in] + [w.shape[1] for w, _ in params]), 128)

    n_pad_small = _round_up(max(n, 8), 128)
    vmem_cap = _vmem_capacity_bytes()

    if (not force_tiled) and _fused_path_fits(n_pad_small, f_max_pad,
                                              num_layers):
        # --- fused single-call path: A_hat read from HBM exactly once ---
        n_pad = n_pad_small
        a_hat = build_norm_adj_padded(edge_index, n, n_pad, edge_weight)
        h0 = jnp.zeros((n_pad, f_max_pad), jnp.bfloat16)
        h0 = h0.at[:n, :f_in].set(x.astype(jnp.bfloat16))
        w_all = jnp.zeros((num_layers, f_max_pad, f_max_pad), jnp.bfloat16)
        b_all = jnp.zeros((num_layers, 1, f_max_pad), jnp.float32)
        for li, (w, b) in enumerate(params):
            fi, fo = w.shape
            w_all = w_all.at[li, :fi, :fo].set(w.astype(jnp.bfloat16))
            b_all = b_all.at[li, 0, :fo].set(b)
        vmem_limit = int(min(vmem_cap - 8 * _MB, 64 * _MB))
        out = fused_gcn_forward(a_hat, h0, w_all, b_all,
                                num_layers=num_layers, vmem_limit=vmem_limit)
        return out[:n, :out_channels]

    # --- tiled per-layer path (large graphs) ---
    n_pad, tm, tk, vmem_limit = _plan_tiles_tiled(n, f_max_pad, f_max_pad)
    a_hat = build_norm_adj_padded(edge_index, n, n_pad, edge_weight)

    f_in_pad = _round_up(f_in, 128)
    h = jnp.zeros((n_pad, f_in_pad), jnp.bfloat16)
    h = h.at[:n, :f_in].set(x.astype(jnp.bfloat16))

    for li, (w, b) in enumerate(params):
        last = li == num_layers - 1
        fi, fo = w.shape
        fi_pad = _round_up(fi, 128)
        fo_pad = _round_up(fo, 128)
        assert h.shape[1] == fi_pad

        w_p = jnp.zeros((fi_pad, fo_pad), jnp.bfloat16).at[:fi, :fo].set(
            w.astype(jnp.bfloat16))
        b_p = jnp.zeros((1, fo_pad), jnp.float32).at[0, :fo].set(b)

        h = gcn_layer_tiled(a_hat, h, w_p, b_p, tm=tm, tk=tk,
                            apply_relu=not last,
                            out_dtype=jnp.float32 if last else jnp.bfloat16,
                            vmem_limit=vmem_limit)

    return h[:n, :out_channels]


# ----------------------------------------------------------------------------
if __name__ == "__main__":
    key = jax.random.PRNGKey(0)

    num_nodes = 8
    in_channels, hidden_channels, out_channels, num_layers = 4, 32, 8, 3

    key, xk = jax.random.split(key)
    x = jax.random.normal(xk, (num_nodes, in_channels), jnp.float32)

    # deterministic directed ring + a few extra edges (2, E)
    src = jnp.array([0, 1, 2, 3, 4, 5, 6, 7, 0, 2, 4, 6], jnp.int32)
    dst = jnp.array([1, 2, 3, 4, 5, 6, 7, 0, 4, 6, 0, 2], jnp.int32)
    edge_index = jnp.stack([src, dst], axis=0)

    params = init_gcn_gen_params(key, in_channels, hidden_channels,
                                 out_channels, num_layers)

    def reference(params, x, edge_index, n):
        a = build_norm_adj(edge_index, n)
        h = x
        for li, (w, b) in enumerate(params):
            h = a @ (h @ w) + b
            if li != len(params) - 1:
                h = jnp.maximum(h, 0.0)
        return h

    ref = reference(params, x, edge_index, num_nodes)

    # 1) fused single-call path (A_hat VMEM-resident across all layers)
    out = gcn_gen_forward(params, x, edge_index)
    jax.block_until_ready(out)
    assert out.shape == (num_nodes, out_channels)
    err1 = float(jnp.max(jnp.abs(out - ref)))
    assert jnp.allclose(out, ref, atol=5e-2, rtol=5e-2), err1

    # 2) tiled per-layer path at tiny size (single-step grid)
    out_t = gcn_gen_forward(params, x, edge_index, force_tiled=True)
    jax.block_until_ready(out_t)
    err2 = float(jnp.max(jnp.abs(out_t - ref)))
    assert jnp.allclose(out_t, ref, atol=5e-2, rtol=5e-2), err2

    # 3) tiled path with a multi-step K reduction (n=300 -> n_pad=384, 3x3 grid)
    n2 = 300
    key, xk2, sk, dk = jax.random.split(key, 4)
    x2 = jax.random.normal(xk2, (n2, in_channels), jnp.float32)
    src2 = jax.random.randint(sk, (600,), 0, n2, dtype=jnp.int32)
    dst2 = jax.random.randint(dk, (600,), 0, n2, dtype=jnp.int32)
    ei2 = jnp.stack([src2, dst2], axis=0)
    out2 = gcn_gen_forward(params, x2, ei2, force_tiled=True)
    jax.block_until_ready(out2)
    ref2 = reference(params, x2, ei2, n2)
    err3 = float(jnp.max(jnp.abs(out2 - ref2)))
    assert jnp.allclose(out2, ref2, atol=1e-1, rtol=1e-1), err3

    print("KERNEL_OK")
</pallas_src>

<mosaic_0001>
module attributes {stable_mosaic.version = 11 : i64} {
  func.func @_fused_gcn_kernel(%arg0: i32, %arg1: memref<128x128xbf16, #tpu.memory_space<vmem>>, %arg2: memref<128x128xbf16, #tpu.memory_space<vmem>>, %arg3: memref<3x128x128xbf16, #tpu.memory_space<vmem>>, %arg4: memref<3x1x128xf32, #tpu.memory_space<vmem>>, %arg5: memref<128x128xf32, #tpu.memory_space<vmem>>) attributes {dimension_semantics = [#tpu.dimension_semantics<arbitrary>], iteration_bounds = array<i64: 1>, scalar_prefetch = 0 : i64, scratch_operands = 0 : i64, tpu.core_type = #tpu.core_type<tc>, window_params = [{pipeline_mode = #tpu.pipeline_mode<synchronous>, transform_indices = @transform_0, window_bounds = array<i64: 128, 128>}, {pipeline_mode = #tpu.pipeline_mode<synchronous>, transform_indices = @transform_1, window_bounds = array<i64: 128, 128>}, {pipeline_mode = #tpu.pipeline_mode<synchronous>, transform_indices = @transform_2, window_bounds = array<i64: 3, 128, 128>}, {pipeline_mode = #tpu.pipeline_mode<synchronous>, transform_indices = @transform_3, window_bounds = array<i64: 3, 1, 128>}, {pipeline_mode = #tpu.pipeline_mode<synchronous>, transform_indices = @transform_4, window_bounds = array<i64: 128, 128>}]} {
    %c0 = arith.constant 0 : index
    %c0_0 = arith.constant 0 : index
    %0 = vector.load %arg1[%c0, %c0_0] : memref<128x128xbf16, #tpu.memory_space<vmem>>, vector<128x128xbf16>
    %c0_1 = arith.constant 0 : index
    %c0_2 = arith.constant 0 : index
    %1 = vector.load %arg2[%c0_1, %c0_2] : memref<128x128xbf16, #tpu.memory_space<vmem>>, vector<128x128xbf16>
    %2 = arith.extf %1 : vector<128x128xbf16> to vector<128x128xf32>
    %c0_3 = arith.constant 0 : index
    %c0_4 = arith.constant 0 : index
    %c0_5 = arith.constant 0 : index
    %3 = vector.load %arg3[%c0_3, %c0_4, %c0_5] : memref<3x128x128xbf16, #tpu.memory_space<vmem>>, vector<1x128x128xbf16>
    %4 = vector.shape_cast %3 : vector<1x128x128xbf16> to vector<128x128xbf16>
    %5 = arith.truncf %2 : vector<128x128xf32> to vector<128x128xbf16>
    %cst = arith.constant dense<0.000000e+00> : vector<128x128xf32>
    %6 = tpu.matmul %5, %4, %cst {dimension_numbers = #tpu.dot_dimension_numbers<[1], [0], [0], [1], [0, 0, 1, 1], [], []>} : vector<128x128xbf16>, vector<128x128xbf16>, vector<128x128xf32> -> vector<128x128xf32>
    %7 = arith.truncf %6 : vector<128x128xf32> to vector<128x128xbf16>
    %cst_6 = arith.constant dense<0.000000e+00> : vector<128x128xf32>
    %8 = tpu.matmul %0, %7, %cst_6 {dimension_numbers = #tpu.dot_dimension_numbers<[1], [0], [0], [1], [0, 0, 1, 1], [], []>} : vector<128x128xbf16>, vector<128x128xbf16>, vector<128x128xf32> -> vector<128x128xf32>
    %c0_7 = arith.constant 0 : index
    %c0_8 = arith.constant 0 : index
    %c0_9 = arith.constant 0 : index
    %9 = vector.load %arg4[%c0_7, %c0_8, %c0_9] : memref<3x1x128xf32, #tpu.memory_space<vmem>>, vector<1x1x128xf32>
    %10 = vector.shape_cast %9 : vector<1x1x128xf32> to vector<1x128xf32>
    %11 = vector.broadcast %10 : vector<1x128xf32> to vector<128x128xf32>
    %12 = arith.addf %8, %11 : vector<128x128xf32>
    %cst_10 = arith.constant 0.000000e+00 : f32
    %13 = vector.broadcast %cst_10 : f32 to vector<128x128xf32>
    %14 = arith.maximumf %12, %13 : vector<128x128xf32>
    %c1 = arith.constant 1 : index
    %c0_11 = arith.constant 0 : index
    %c0_12 = arith.constant 0 : index
    %15 = vector.load %arg3[%c1, %c0_11, %c0_12] : memref<3x128x128xbf16, #tpu.memory_space<vmem>>, vector<1x128x128xbf16>
    %16 = vector.shape_cast %15 : vector<1x128x128xbf16> to vector<128x128xbf16>
    %17 = arith.truncf %14 : vector<128x128xf32> to vector<128x128xbf16>
    %cst_13 = arith.constant dense<0.000000e+00> : vector<128x128xf32>
    %18 = tpu.matmul %17, %16, %cst_13 {dimension_numbers = #tpu.dot_dimension_numbers<[1], [0], [0], [1], [0, 0, 1, 1], [], []>} : vector<128x128xbf16>, vector<128x128xbf16>, vector<128x128xf32> -> vector<128x128xf32>
    %19 = arith.truncf %18 : vector<128x128xf32> to vector<128x128xbf16>
    %cst_14 = arith.constant dense<0.000000e+00> : vector<128x128xf32>
    %20 = tpu.matmul %0, %19, %cst_14 {dimension_numbers = #tpu.dot_dimension_numbers<[1], [0], [0], [1], [0, 0, 1, 1], [], []>} : vector<128x128xbf16>, vector<128x128xbf16>, vector<128x128xf32> -> vector<128x128xf32>
    %c1_15 = arith.constant 1 : index
    %c0_16 = arith.constant 0 : index
    %c0_17 = arith.constant 0 : index
    %21 = vector.load %arg4[%c1_15, %c0_16, %c0_17] : memref<3x1x128xf32, #tpu.memory_space<vmem>>, vector<1x1x128xf32>
    %22 = vector.shape_cast %21 : vector<1x1x128xf32> to vector<1x128xf32>
    %23 = vector.broadcast %22 : vector<1x128xf32> to vector<128x128xf32>
    %24 = arith.addf %20, %23 : vector<128x128xf32>
    %cst_18 = arith.constant 0.000000e+00 : f32
    %25 = vector.broadcast %cst_18 : f32 to vector<128x128xf32>
    %26 = arith.maximumf %24, %25 : vector<128x128xf32>
    %c2 = arith.constant 2 : index
    %c0_19 = arith.constant 0 : index
    %c0_20 = arith.constant 0 : index
    %27 = vector.load %arg3[%c2, %c0_19, %c0_20] : memref<3x128x128xbf16, #tpu.memory_space<vmem>>, vector<1x128x128xbf16>
    %28 = vector.shape_cast %27 : vector<1x128x128xbf16> to vector<128x128xbf16>
    %29 = arith.truncf %26 : vector<128x128xf32> to vector<128x128xbf16>
    %cst_21 = arith.constant dense<0.000000e+00> : vector<128x128xf32>
    %30 = tpu.matmul %29, %28, %cst_21 {dimension_numbers = #tpu.dot_dimension_numbers<[1], [0], [0], [1], [0, 0, 1, 1], [], []>} : vector<128x128xbf16>, vector<128x128xbf16>, vector<128x128xf32> -> vector<128x128xf32>
    %31 = arith.truncf %30 : vector<128x128xf32> to vector<128x128xbf16>
    %cst_22 = arith.constant dense<0.000000e+00> : vector<128x128xf32>
    %32 = tpu.matmul %0, %31, %cst_22 {dimension_numbers = #tpu.dot_dimension_numbers<[1], [0], [0], [1], [0, 0, 1, 1], [], []>} : vector<128x128xbf16>, vector<128x128xbf16>, vector<128x128xf32> -> vector<128x128xf32>
    %c2_23 = arith.constant 2 : index
    %c0_24 = arith.constant 0 : index
    %c0_25 = arith.constant 0 : index
    %33 = vector.load %arg4[%c2_23, %c0_24, %c0_25] : memref<3x1x128xf32, #tpu.memory_space<vmem>>, vector<1x1x128xf32>
    %34 = vector.shape_cast %33 : vector<1x1x128xf32> to vector<1x128xf32>
    %35 = vector.broadcast %34 : vector<1x128xf32> to vector<128x128xf32>
    %36 = arith.addf %32, %35 : vector<128x128xf32>
    %c0_26 = arith.constant 0 : index
    %c0_27 = arith.constant 0 : index
    %37 = vector.load %arg5[%c0_26, %c0_27] : memref<128x128xf32, #tpu.memory_space<vmem>>, vector<128x128xf32>
    tpu.vector_store %arg5[%c0_26, %c0_27], %36 {strides = array<i32>} : memref<128x128xf32, #tpu.memory_space<vmem>>, vector<128x128xf32>,
    return
  }
  func.func @transform_0(%arg0: i32) -> (i32, i32) {
    %c0_i32 = arith.constant 0 : i32
    %c0_i32_0 = arith.constant 0 : i32
    %c0_i32_1 = arith.constant 0 : i32
    return %c0_i32, %c0_i32_0 : i32, i32
  }
  func.func @transform_1(%arg0: i32) -> (i32, i32) {
    %c0_i32 = arith.constant 0 : i32
    %c0_i32_0 = arith.constant 0 : i32
    %c0_i32_1 = arith.constant 0 : i32
    return %c0_i32, %c0_i32_0 : i32, i32
  }
  func.func @transform_2(%arg0: i32) -> (i32, i32, i32) {
    %c0_i32 = arith.constant 0 : i32
    %c0_i32_0 = arith.constant 0 : i32
    %c0_i32_1 = arith.constant 0 : i32
    %c0_i32_2 = arith.constant 0 : i32
    return %c0_i32, %c0_i32_0, %c0_i32_1 : i32, i32, i32
  }
  func.func @transform_3(%arg0: i32) -> (i32, i32, i32) {
    %c0_i32 = arith.constant 0 : i32
    %c0_i32_0 = arith.constant 0 : i32
    %c0_i32_1 = arith.constant 0 : i32
    %c0_i32_2 = arith.constant 0 : i32
    return %c0_i32, %c0_i32_0, %c0_i32_1 : i32, i32, i32
  }
  func.func @transform_4(%arg0: i32) -> (i32, i32) {
    %c0_i32 = arith.constant 0 : i32
    %c0_i32_0 = arith.constant 0 : i32
    %c0_i32_1 = arith.constant 0 : i32
    return %c0_i32, %c0_i32_0 : i32, i32
  }
}

</mosaic_0001>

<bundles_post_ra>
// kernel: tpu_custom_call.1
= control target key start
LH: loop header
LB: loop body
LE: loop exit
PB: predicated region body
PF: predicated region fallthrough
CT: control target
= control target key end

     0   :  { %9 = vsyncpa [#allocation3], 0  ;;  %s1269_s0 = inlined_call_operand.hbm [shape: bf16[128,128], index: 0, kind: input, shape index: {}]   ;;  %s1270_s1 = inlined_call_operand.hbm [shape: bf16[128,128], index: 1, kind: input, shape index: {}]   ;;  %s1271_s2 = inlined_call_operand.hbm [shape: bf16[3,128,128], index: 2, kind: input, shape index: {}]   ;;  %s1272_s3 = inlined_call_operand.hbm [shape: f32[3,1,128], index: 3, kind: input, shape index: {}]   ;;  %s1273_s4 = inlined_call_operand.hbm [shape: f32[128,128], index: 4, kind: output, shape index: {}]  }
   0x1   :  { %10 = vsyncpa [#allocation6], 0 }
   0x2   :  { %11 = vsyncpa [#allocation9], 0 }
   0x3   :  { %12 = vsyncpa [#allocation4], 0  ;;  %s30_s17 = sshll.u32 %s1270_s1, 4  ;;  %s1178_s18 = smov [#allocation5]   ;;  %s31_s17 = int_to_ptr.hbm [resolvable:$true] %s30_s17 }
   0x4   :  { %s32_s19 = sshll.u32 %s1178_s18, 4  ;;  %s17_s22 = sshll.u32 %s1269_s0, 4  ;;  %s33_s19 = int_to_ptr.vmem [resolvable:$true] %s32_s19  ;;  %s18_s22 = int_to_ptr.hbm [resolvable:$true] %s17_s22 }
   0x5   :  { %s1179_s23 = smov 64   ;;  %s1180_s24 = smov 4  }
   0x6   :  { %38 = dma.hbm_to_vmem [thread:$0]  %s31_s17, 1024, %s33_s19, [#allocation6], %s1179_s23, %s1179_s23, %s1180_s24  }
   0x7   :  { %s1181_s25 = smov [#allocation2]   ;;  %s43_s29 = sshll.u32 %s1271_s2, 4  ;;  %s44_s29 = int_to_ptr.hbm [resolvable:$true] %s43_s29 }
   0x8   :  { %s19_s26 = sshll.u32 %s1181_s25, 4  ;;  %s56_s5 = sshll.u32 %s1272_s3, 4  ;;  %s20_s26 = int_to_ptr.vmem [resolvable:$true] %s19_s26  ;;  %s57_s5 = int_to_ptr.hbm [resolvable:$true] %s56_s5 }
   0x9   :  { %25 = dma.hbm_to_vmem [thread:$0]  %s18_s22, 1024, %s20_s26, [#allocation3], %s1179_s23, %s1179_s23, %s1180_s24  }
   0xa   :  { %s1182_s6 = smov [#allocation7]   ;;  %s1183_s0 = smov [#allocation8]  }
   0xb   :  { %s45_s7 = sshll.u32 %s1182_s6, 4  ;;  %s58_s8 = sshll.u32 %s1183_s0, 4  ;;  %s46_s7 = int_to_ptr.vmem [resolvable:$true] %s45_s7  ;;  %s59_s8 = int_to_ptr.vmem [resolvable:$true] %s58_s8 }
   0xc   :  { %51 = dma.hbm_to_vmem [thread:$0]  %s44_s29, 3072, %s46_s7, [#allocation6], %s1179_s23, %s1179_s23, %s1180_s24  }
   0xd   :  { %s1184_s9 = smov 16   ;;  %s1185_s10 = smov 1  }
   0xe   :  { %64 = dma.hbm_to_vmem [thread:$0]  %s57_s5, 48, %s59_s8, [#allocation9], %s1184_s9, %s1184_s9, %s1185_s10  }
   0xf   :  { %1170 = dma.done.wait [#allocation3], 1024  }
  0x10   :  { %1171 = vsyncadd [#allocation3], 4294966272 }
  0x11   :  { %1172 = dma.done.wait [#allocation6], 4096  }
  0x12   :  { %1173 = vsyncadd [#allocation6], 4294963200 }
  0x13   :  { %1174 = dma.done.wait [#allocation9], 48  }
  0x14   :  { %1175 = vsyncadd [#allocation9], 4294967248  ;;  %v1003_v0 = vld [vmem:[#allocation7 + $0x38] sm:$0xff]  ;;  %v1002_v1 = vld [vmem:[#allocation7 + $0x30] sm:$0xff]  ;;  %s1186_s2 = smov [#allocation10]   ;;  %s805_s13 = sshll.u32 %s1273_s4, 4  ;;  %s806_s13 = int_to_ptr.hbm [resolvable:$true] %s805_s13 }
  0x15   :  { %1020 = vmatpush.bf16.msra.mxu2 %v1003_v0  ;;  %225 = vmatpush.bf16.msra.mxu0 %v1003_v0  ;;  %v1001_v2 = vld [vmem:[#allocation7 + $0x28] sm:$0xff]  ;;  %v1000_v3 = vld [vmem:[#allocation7 + $0x20] sm:$0xff]  ;;  %v999_v4 = vld [vmem:[#allocation7 + $0x18] sm:$0xff]  ;;  %s803_s3 = sshll.u32 %s1186_s2, 4  ;;  %s1187_s14 = smov 128   ;;  %s804_s3 = int_to_ptr.vmem [resolvable:$true] %s803_s3 }
  0x16   :  { %v998_v5 = vld [vmem:[#allocation7 + $0x10] sm:$0xff]  ;;  %v997_v6 = vld [vmem:[#allocation7 + $0x8] sm:$0xff]  ;;  %v996_v7 = vld [vmem:[#allocation7] sm:$0xff]  ;;  %s1188_s15 = smov 8  }
  0x17   :  { %v992_v8 = vld [vmem:[#allocation5 + $0x20] sm:$0xff]  ;;  %v993_v10 = vld [vmem:[#allocation5 + $0x28] sm:$0xff]  ;;  %v994_v12 = vld [vmem:[#allocation5 + $0x30] sm:$0xff] }
  0x18   :  { %v988_v9 = vld [vmem:[#allocation5] sm:$0xff]  ;;  %v989_v11 = vld [vmem:[#allocation5 + $0x8] sm:$0xff]  ;;  %v990_v13 = vld [vmem:[#allocation5 + $0x10] sm:$0xff] }
  0x19   :  { %1021 = vmatpush.bf16.msra.mxu2 %v1002_v1  ;;  %226 = vmatpush.bf16.msra.mxu0 %v1002_v1  ;;  %v995_v14 = vld [vmem:[#allocation5 + $0x38] sm:$0xff]  ;;  %v1226_v40 = vld [vmem:[#allocation2] sm:$0xff]  ;;  %v1229_v41 = vld [vmem:[#allocation2 + $0x8] sm:$0xff] }
  0x1a   :  { %v991_v15 = vld [vmem:[#allocation5 + $0x18] sm:$0xff]  ;;  %v1232_v42 = vld [vmem:[#allocation2 + $0x20] sm:$0xff]  ;;  %v1235_v43 = vld [vmem:[#allocation2 + $0x10] sm:$0xff] }
  0x1b   :  { %v1237_v44 = vld [vmem:[#allocation2 + $0x28] sm:$0xff]  ;;  %v1011_v45 = vld [vmem:[#allocation7 + $0x78] sm:$0xff]  ;;  %v1010_v46 = vld [vmem:[#allocation7 + $0x70] sm:$0xff] }
  0x1c   :  { %v1009_v47 = vld [vmem:[#allocation7 + $0x68] sm:$0xff]  ;;  %v1241_v48 = vld [vmem:[#allocation2 + $0x18] sm:$0xff]  ;;  %v1008_v49 = vld [vmem:[#allocation7 + $0x60] sm:$0xff] }
  0x1d   :  { %1022 = vmatpush.bf16.msra.mxu2 %v1001_v2  ;;  %227 = vmatpush.bf16.msra.mxu0 %v1001_v2  ;;  %v1243_v50 = vld [vmem:[#allocation2 + $0x30] sm:$0xff]  ;;  %v1247_v51 = vld [vmem:[#allocation2 + $0x38] sm:$0xff]  ;;  %v1005_v54 = vld [vmem:[#allocation7 + $0x48] sm:$0xff] }
  0x1e   :  { %v1007_v52 = vld [vmem:[#allocation7 + $0x58] sm:$0xff]  ;;  %v1006_v53 = vld [vmem:[#allocation7 + $0x50] sm:$0xff]  ;;  %v1004_v55 = vld [vmem:[#allocation7 + $0x40] sm:$0xff] }
  0x1f   :  { %v1047_v57 = vld [vmem:[#allocation8] ss:$0 sm:$0xff] }
  0x21   :  { %1023 = vmatpush.bf16.msra.mxu2 %v1000_v3  ;;  %228 = vmatpush.bf16.msra.mxu0 %v1000_v3 }
  0x25   :  { %1024 = vmatpush.bf16.msra.mxu2 %v999_v4  ;;  %229 = vmatpush.bf16.msra.mxu0 %v999_v4 }
  0x29   :  { %1025 = vmatpush.bf16.msra.mxu2 %v998_v5  ;;  %230 = vmatpush.bf16.msra.mxu0 %v998_v5 }
  0x2d   :  { %1026 = vmatpush.bf16.msra.mxu2 %v997_v6  ;;  %231 = vmatpush.bf16.msra.mxu0 %v997_v6 }
  0x31   :  { %1027 = vmatpush.bf16.msra.mxu2 %v996_v7  ;;  %232 = vmatpush.bf16.msra.mxu0 %v996_v7 }
  0x34   :  { %253 = vmatmul.bf16.vlgmr.msra.gmra.mxu2 %v992_v8  ;;  %233 = vmatmul.bf16.vlgmr.msra.gmra.mxu0 %v988_v9 }
  0x35   :  { %472 = vmatpush.bf16.msrb.mxu2 %v1011_v45 }
  0x39   :  { %473 = vmatpush.bf16.msrb.mxu2 %v1010_v46 }
  0x3d   :  { %474 = vmatpush.bf16.msrb.mxu2 %v1009_v47 }
  0x41   :  { %475 = vmatpush.bf16.msrb.mxu2 %v1008_v49 }
  0x44   :  { %258 = vmatmul.bf16.gmra.mxu2 %v993_v10  ;;  %238 = vmatmul.bf16.gmra.mxu0 %v989_v11 }
  0x45   :  { %476 = vmatpush.bf16.msrb.mxu2 %v1007_v52 }
  0x49   :  { %477 = vmatpush.bf16.msrb.mxu2 %v1006_v53 }
  0x4d   :  { %478 = vmatpush.bf16.msrb.mxu2 %v1005_v54 }
  0x51   :  { %479 = vmatpush.bf16.msrb.mxu2 %v1004_v55 }
  0x54   :  { %263 = vmatmul.bf16.gmra.mxu2 %v994_v12  ;;  %243 = vmatmul.bf16.gmra.mxu0 %v990_v13 }
  0x64   :  { %268 = vmatmul.bf16.gmra.mxu2 %v995_v14  ;;  %248 = vmatmul.bf16.gmra.mxu0 %v991_v15 }
  0xb1   :  { %v234_v17 = vpop.f32.mrf.mxu0 }
  0xb7   :  { %v254_v16 = vpop.f32.mrf.mxu2 }
  0xb9   :  { %v236_v19 = vpop.f32.mrf.mxu0 }
  0xba   :  { %v274_v39 = vpack.c.bf16 %v236_v19, %v234_v17 }
  0xbf   :  { %v256_v18 = vpop.f32.mrf.mxu2 }
  0xc0   :  { %v278_v34 = vpack.c.bf16 %v256_v18, %v254_v16 }
  0xc1   :  { %v239_v21 = vpop.f32.mrf.mxu0 }
  0xc7   :  { %v259_v20 = vpop.f32.mrf.mxu2 }
  0xc9   :  { %v241_v23 = vpop.f32.mrf.mxu0 }
  0xca   :  { %v275_v38 = vpack.c.bf16 %v241_v23, %v239_v21 }
  0xcf   :  { %v261_v22 = vpop.f32.mrf.mxu2 }
  0xd0   :  { %v279_v33 = vpack.c.bf16 %v261_v22, %v259_v20 }
  0xd1   :  { %v244_v25 = vpop.f32.mrf.mxu0 }
  0xd7   :  { %v264_v24 = vpop.f32.mrf.mxu2 }
  0xd9   :  { %v246_v28 = vpop.f32.mrf.mxu0 }
  0xda   :  { %v276_v37 = vpack.c.bf16 %v246_v28, %v244_v25 }
  0xdf   :  { %v266_v26 = vpop.f32.mrf.mxu2 }
  0xe0   :  { %v280_v32 = vpack.c.bf16 %v266_v26, %v264_v24 }
  0xe1   :  { %v249_v31 = vpop.f32.mrf.mxu0 }
  0xe7   :  { %v269_v27 = vpop.f32.mrf.mxu2 }
  0xe9   :  { %v251_v35 = vpop.f32.mrf.mxu0 }
  0xea   :  { %v277_v36 = vpack.c.bf16 %v251_v35, %v249_v31 }
  0xef   :  { %v271_v29 = vpop.f32.mrf.mxu2 }
  0xf0   :  { %v281_v30 = vpack.c.bf16 %v271_v29, %v269_v27 }
  0xf2   :  { %334 = vmatpush.bf16.msra.mxu1 %v281_v30  ;;  %1028 = vmatpush.bf16.msra.mxu3 %v281_v30 }
  0xf6   :  { %335 = vmatpush.bf16.msra.mxu1 %v280_v32  ;;  %1029 = vmatpush.bf16.msra.mxu3 %v280_v32 }
  0xfa   :  { %336 = vmatpush.bf16.msra.mxu1 %v279_v33  ;;  %1030 = vmatpush.bf16.msra.mxu3 %v279_v33 }
  0xfe   :  { %337 = vmatpush.bf16.msra.mxu1 %v278_v34  ;;  %1031 = vmatpush.bf16.msra.mxu3 %v278_v34 }
 0x102   :  { %338 = vmatpush.bf16.msra.mxu1 %v277_v36  ;;  %1032 = vmatpush.bf16.msra.mxu3 %v277_v36 }
 0x106   :  { %339 = vmatpush.bf16.msra.mxu1 %v276_v37  ;;  %1033 = vmatpush.bf16.msra.mxu3 %v276_v37 }
 0x10a   :  { %340 = vmatpush.bf16.msra.mxu1 %v275_v38  ;;  %1034 = vmatpush.bf16.msra.mxu3 %v275_v38 }
 0x10e   :  { %341 = vmatpush.bf16.msra.mxu1 %v274_v39  ;;  %1035 = vmatpush.bf16.msra.mxu3 %v274_v39 }
 0x111   :  { %342 = vmatmul.bf16.vlgmr.msra.gmra.mxu1 %v1226_v40  ;;  %362 = vmatmul.bf16.vlgmr.msra.gmra.mxu3 %v1232_v42 }
 0x121   :  { %347 = vmatmul.bf16.gmra.mxu1 %v1229_v41  ;;  %367 = vmatmul.bf16.gmra.mxu3 %v1237_v44 }
 0x131   :  { %352 = vmatmul.bf16.gmra.mxu1 %v1235_v43  ;;  %372 = vmatmul.bf16.gmra.mxu3 %v1243_v50 }
 0x141   :  { %357 = vmatmul.bf16.gmra.mxu1 %v1241_v48  ;;  %377 = vmatmul.bf16.gmra.mxu3 %v1247_v51 }
 0x18e   :  { %v343_v56 = vpop.f32.mrf.mxu1 }
 0x18f   :  { %v344_v58 = vadd.f32 %v1047_v57, %v343_v56 }
 0x191   :  { %v383_v61 = vmax.f32 %v344_v58, 0.0 }
 0x194   :  { %v363_v13 = vpop.f32.mrf.mxu3 }
 0x195   :  { %v364_v24 = vadd.f32 %v1047_v57, %v363_v13 }
 0x196   :  { %v345_v59 = vpop.f32.mrf.mxu1 }
 0x197   :  { %v346_v60 = vadd.f32 %v1047_v57, %v345_v59  ;;  %v391_v26 = vmax.f32 %v364_v24, 0.0  ;;  %v1012_v24 = vld [vmem:[#allocation7 + $0x80] sm:$0xff] }
 0x199   :  { %v384_v62 = vmax.f32 %v346_v60, 0.0 }
 0x19b   :  { %v416_v63 = vpack.c.bf16 %v384_v62, %v383_v61 }
 0x19c   :  { %v365_v16 = vpop.f32.mrf.mxu3 }
 0x19d   :  { %480 = vmatmul.bf16.vlgmr.msrb.gmra.mxu2 %v416_v63  ;;  %v366_v25 = vadd.f32 %v1047_v57, %v365_v16 }
 0x19e   :  { %v348_v0 = vpop.f32.mrf.mxu1 }
 0x19f   :  { %v349_v1 = vadd.f32 %v1047_v57, %v348_v0  ;;  %v392_v27 = vmax.f32 %v366_v25, 0.0 }
 0x1a1   :  { %v385_v4 = vmax.f32 %v349_v1, 0.0  ;;  %v420_v29 = vpack.c.bf16 %v392_v27, %v391_v26  ;;  %v1048_v26 = vld [vmem:[#allocation8 + $0x1] ss:$0 sm:$0xff] }
 0x1a4   :  { %v368_v23 = vpop.f32.mrf.mxu3 }
 0x1a5   :  { %v369_v31 = vadd.f32 %v1047_v57, %v368_v23  ;;  %v1013_v23 = vld [vmem:[#allocation7 + $0x88] sm:$0xff] }
 0x1a6   :  { %v350_v2 = vpop.f32.mrf.mxu1 }
 0x1a7   :  { %v351_v3 = vadd.f32 %v1047_v57, %v350_v2  ;;  %v393_v33 = vmax.f32 %v369_v31, 0.0 }
 0x1a9   :  { %v386_v5 = vmax.f32 %v351_v3, 0.0 }
 0x1ab   :  { %v417_v6 = vpack.c.bf16 %v386_v5, %v385_v4 }
 0x1ac   :  { %v370_v28 = vpop.f32.mrf.mxu3 }
 0x1ad   :  { %485 = vmatmul.bf16.gmra.mxu2 %v417_v6  ;;  %v371_v32 = vadd.f32 %v1047_v57, %v370_v28 }
 0x1ae   :  { %v353_v7 = vpop.f32.mrf.mxu1 }
 0x1af   :  { %v354_v8 = vadd.f32 %v1047_v57, %v353_v7  ;;  %v394_v34 = vmax.f32 %v371_v32, 0.0 }
 0x1b1   :  { %v387_v11 = vmax.f32 %v354_v8, 0.0  ;;  %v421_v35 = vpack.c.bf16 %v394_v34, %v393_v33 }
 0x1b4   :  { %v373_v30 = vpop.f32.mrf.mxu3 }
 0x1b5   :  { %v374_v37 = vadd.f32 %v1047_v57, %v373_v30 }
 0x1b6   :  { %v355_v9 = vpop.f32.mrf.mxu1 }
 0x1b7   :  { %v356_v10 = vadd.f32 %v1047_v57, %v355_v9  ;;  %v395_v45 = vmax.f32 %v374_v37, 0.0 }
 0x1b9   :  { %v388_v12 = vmax.f32 %v356_v10, 0.0 }
 0x1bb   :  { %v418_v14 = vpack.c.bf16 %v388_v12, %v387_v11 }
 0x1bc   :  { %v375_v36 = vpop.f32.mrf.mxu3 }
 0x1bd   :  { %490 = vmatmul.bf16.gmra.mxu2 %v418_v14  ;;  %v376_v38 = vadd.f32 %v1047_v57, %v375_v36 }
 0x1be   :  { %v358_v15 = vpop.f32.mrf.mxu1 }
 0x1bf   :  { %v359_v17 = vadd.f32 %v1047_v57, %v358_v15  ;;  %v396_v46 = vmax.f32 %v376_v38, 0.0 }
 0x1c1   :  { %v389_v20 = vmax.f32 %v359_v17, 0.0  ;;  %v422_v47 = vpack.c.bf16 %v396_v46, %v395_v45  ;;  %v1019_v17 = vld [vmem:[#allocation7 + $0xb8] sm:$0xff] }
 0x1c2   :  { %672 = vmatpush.bf16.msrb.mxu0 %v1019_v17 }
 0x1c4   :  { %v378_v39 = vpop.f32.mrf.mxu3 }
 0x1c5   :  { %v379_v52 = vadd.f32 %v1047_v57, %v378_v39 }
 0x1c6   :  { %v360_v18 = vpop.f32.mrf.mxu1 }
 0x1c7   :  { %v361_v19 = vadd.f32 %v1047_v57, %v360_v18  ;;  %v397_v54 = vmax.f32 %v379_v52, 0.0  ;;  %v1018_v18 = vld [vmem:[#allocation7 + $0xb0] sm:$0xff] }
 0x1c8   :  { %673 = vmatpush.bf16.msrb.mxu0 %v1018_v18 }
 0x1c9   :  { %v390_v21 = vmax.f32 %v361_v19, 0.0  ;;  %v1017_v19 = vld [vmem:[#allocation7 + $0xa8] sm:$0xff] }
 0x1cb   :  { %v419_v22 = vpack.c.bf16 %v390_v21, %v389_v20  ;;  %v1016_v20 = vld [vmem:[#allocation7 + $0xa0] sm:$0xff]  ;;  %v1015_v21 = vld [vmem:[#allocation7 + $0x98] sm:$0xff] }
 0x1cc   :  { %v380_v49 = vpop.f32.mrf.mxu3  ;;  %674 = vmatpush.bf16.msrb.mxu0 %v1017_v19 }
 0x1cd   :  { %495 = vmatmul.bf16.gmra.mxu2 %v419_v22  ;;  %v381_v53 = vadd.f32 %v1047_v57, %v380_v49  ;;  %v1014_v22 = vld [vmem:[#allocation7 + $0x90] sm:$0xff] }
 0x1cf   :  { %v398_v55 = vmax.f32 %v381_v53, 0.0 }
 0x1d0   :  { %675 = vmatpush.bf16.msrb.mxu0 %v1016_v20 }
 0x1d1   :  { %v423_v56 = vpack.c.bf16 %v398_v55, %v397_v54 }
 0x1d4   :  { %676 = vmatpush.bf16.msrb.mxu0 %v1015_v21 }
 0x1d8   :  { %677 = vmatpush.bf16.msrb.mxu0 %v1014_v22 }
 0x1dc   :  { %678 = vmatpush.bf16.msrb.mxu0 %v1013_v23 }
 0x1dd   :  { %500 = vmatmul.bf16.gmra.mxu2 %v420_v29 }
 0x1e0   :  { %679 = vmatpush.bf16.msrb.mxu0 %v1012_v24 }
 0x1ed   :  { %505 = vmatmul.bf16.gmra.mxu2 %v421_v35 }
 0x1fd   :  { %510 = vmatmul.bf16.gmra.mxu2 %v422_v47 }
 0x20d   :  { %515 = vmatmul.bf16.gmra.mxu2 %v423_v56 }
 0x220   :  { %v481_v58 = vpop.f32.mrf.mxu2 }
 0x228   :  { %v483_v59 = vpop.f32.mrf.mxu2 }
 0x229   :  { %v521_v60 = vpack.c.bf16 %v483_v59, %v481_v58 }
 0x230   :  { %v486_v61 = vpop.f32.mrf.mxu2 }
 0x238   :  { %v488_v62 = vpop.f32.mrf.mxu2 }
 0x239   :  { %v522_v63 = vpack.c.bf16 %v488_v62, %v486_v61 }
 0x240   :  { %v491_v0 = vpop.f32.mrf.mxu2 }
 0x248   :  { %v493_v1 = vpop.f32.mrf.mxu2 }
 0x249   :  { %v523_v2 = vpack.c.bf16 %v493_v1, %v491_v0 }
 0x250   :  { %v496_v3 = vpop.f32.mrf.mxu2 }
 0x258   :  { %v498_v4 = vpop.f32.mrf.mxu2 }
 0x259   :  { %v524_v5 = vpack.c.bf16 %v498_v4, %v496_v3 }
 0x260   :  { %v501_v6 = vpop.f32.mrf.mxu2 }
 0x268   :  { %v503_v7 = vpop.f32.mrf.mxu2 }
 0x269   :  { %v525_v16 = vpack.c.bf16 %v503_v7, %v501_v6 }
 0x270   :  { %v506_v8 = vpop.f32.mrf.mxu2 }
 0x278   :  { %v508_v57 = vpop.f32.mrf.mxu2 }
 0x279   :  { %v526_v15 = vpack.c.bf16 %v508_v57, %v506_v8 }
 0x280   :  { %v511_v9 = vpop.f32.mrf.mxu2 }
 0x288   :  { %v513_v10 = vpop.f32.mrf.mxu2 }
 0x289   :  { %v527_v14 = vpack.c.bf16 %v513_v10, %v511_v9 }
 0x290   :  { %v516_v11 = vpop.f32.mrf.mxu2 }
 0x298   :  { %v518_v12 = vpop.f32.mrf.mxu2 }
 0x299   :  { %v528_v13 = vpack.c.bf16 %v518_v12, %v516_v11 }
 0x29b   :  { %534 = vmatpush.bf16.msrb.mxu3 %v528_v13 }
 0x29f   :  { %535 = vmatpush.bf16.msrb.mxu3 %v527_v14 }
 0x2a3   :  { %536 = vmatpush.bf16.msrb.mxu3 %v526_v15 }
 0x2a7   :  { %537 = vmatpush.bf16.msrb.mxu3 %v525_v16 }
 0x2ab   :  { %538 = vmatpush.bf16.msrb.mxu3 %v524_v5 }
 0x2af   :  { %539 = vmatpush.bf16.msrb.mxu3 %v523_v2 }
 0x2b3   :  { %540 = vmatpush.bf16.msrb.mxu3 %v522_v63 }
 0x2b7   :  { %541 = vmatpush.bf16.msrb.mxu3 %v521_v60 }
 0x2ba   :  { %542 = vmatmul.bf16.vlgmr.msrb.gmra.mxu3 %v1226_v40 }
 0x2ca   :  { %547 = vmatmul.bf16.gmra.mxu3 %v1229_v41 }
 0x2da   :  { %552 = vmatmul.bf16.gmra.mxu3 %v1235_v43 }
 0x2ea   :  { %557 = vmatmul.bf16.gmra.mxu3 %v1241_v48 }
 0x2fa   :  { %562 = vmatmul.bf16.gmra.mxu3 %v1232_v42 }
 0x30a   :  { %567 = vmatmul.bf16.gmra.mxu3 %v1237_v44 }
 0x31a   :  { %572 = vmatmul.bf16.gmra.mxu3 %v1243_v50 }
 0x32a   :  { %577 = vmatmul.bf16.gmra.mxu3 %v1247_v51 }
 0x33d   :  { %v543_v25 = vpop.f32.mrf.mxu3 }
 0x33e   :  { %v544_v27 = vadd.f32 %v1048_v26, %v543_v25 }
 0x340   :  { %v583_v30 = vmax.f32 %v544_v27, 0.0 }
 0x345   :  { %v545_v28 = vpop.f32.mrf.mxu3 }
 0x346   :  { %v546_v29 = vadd.f32 %v1048_v26, %v545_v28 }
 0x348   :  { %v584_v31 = vmax.f32 %v546_v29, 0.0 }
 0x34a   :  { %v616_v32 = vpack.c.bf16 %v584_v31, %v583_v30 }
 0x34c   :  { %680 = vmatmul.bf16.vlgmr.msrb.gmra.mxu0 %v616_v32 }
 0x34d   :  { %v548_v33 = vpop.f32.mrf.mxu3 }
 0x34e   :  { %v549_v34 = vadd.f32 %v1048_v26, %v548_v33 }
 0x350   :  { %v585_v37 = vmax.f32 %v549_v34, 0.0 }
 0x355   :  { %v550_v35 = vpop.f32.mrf.mxu3 }
 0x356   :  { %v551_v36 = vadd.f32 %v1048_v26, %v550_v35 }
 0x358   :  { %v586_v38 = vmax.f32 %v551_v36, 0.0 }
 0x35a   :  { %v617_v39 = vpack.c.bf16 %v586_v38, %v585_v37 }
 0x35c   :  { %685 = vmatmul.bf16.gmra.mxu0 %v617_v39 }
 0x35d   :  { %v553_v45 = vpop.f32.mrf.mxu3 }
 0x35e   :  { %v554_v46 = vadd.f32 %v1048_v26, %v553_v45 }
 0x360   :  { %v587_v52 = vmax.f32 %v554_v46, 0.0 }
 0x365   :  { %v555_v47 = vpop.f32.mrf.mxu3 }
 0x366   :  { %v556_v49 = vadd.f32 %v1048_v26, %v555_v47 }
 0x368   :  { %v588_v53 = vmax.f32 %v556_v49, 0.0 }
 0x36a   :  { %v618_v54 = vpack.c.bf16 %v588_v53, %v587_v52 }
 0x36c   :  { %690 = vmatmul.bf16.gmra.mxu0 %v618_v54 }
 0x36d   :  { %v558_v55 = vpop.f32.mrf.mxu3 }
 0x36e   :  { %v559_v56 = vadd.f32 %v1048_v26, %v558_v55 }
 0x370   :  { %v589_v60 = vmax.f32 %v559_v56, 0.0 }
 0x375   :  { %v560_v58 = vpop.f32.mrf.mxu3 }
 0x376   :  { %v561_v59 = vadd.f32 %v1048_v26, %v560_v58 }
 0x378   :  { %v590_v61 = vmax.f32 %v561_v59, 0.0  ;;  %v1049_v59 = vld [vmem:[#allocation8 + $0x2] ss:$0 sm:$0xff] }
 0x37a   :  { %v619_v62 = vpack.c.bf16 %v590_v61, %v589_v60 }
 0x37c   :  { %695 = vmatmul.bf16.gmra.mxu0 %v619_v62 }
 0x37d   :  { %v563_v63 = vpop.f32.mrf.mxu3 }
 0x37e   :  { %v564_v0 = vadd.f32 %v1048_v26, %v563_v63 }
 0x380   :  { %v591_v3 = vmax.f32 %v564_v0, 0.0 }
 0x385   :  { %v565_v1 = vpop.f32.mrf.mxu3 }
 0x386   :  { %v566_v2 = vadd.f32 %v1048_v26, %v565_v1 }
 0x388   :  { %v592_v4 = vmax.f32 %v566_v2, 0.0 }
 0x38a   :  { %v620_v5 = vpack.c.bf16 %v592_v4, %v591_v3 }
 0x38c   :  { %700 = vmatmul.bf16.gmra.mxu0 %v620_v5 }
 0x38d   :  { %v568_v6 = vpop.f32.mrf.mxu3 }
 0x38e   :  { %v569_v7 = vadd.f32 %v1048_v26, %v568_v6 }
 0x390   :  { %v593_v9 = vmax.f32 %v569_v7, 0.0 }
 0x395   :  { %v570_v8 = vpop.f32.mrf.mxu3 }
 0x396   :  { %v571_v57 = vadd.f32 %v1048_v26, %v570_v8 }
 0x398   :  { %v594_v10 = vmax.f32 %v571_v57, 0.0 }
 0x39a   :  { %v621_v11 = vpack.c.bf16 %v594_v10, %v593_v9 }
 0x39c   :  { %705 = vmatmul.bf16.gmra.mxu0 %v621_v11 }
 0x39d   :  { %v573_v12 = vpop.f32.mrf.mxu3 }
 0x39e   :  { %v574_v13 = vadd.f32 %v1048_v26, %v573_v12 }
 0x3a0   :  { %v595_v16 = vmax.f32 %v574_v13, 0.0 }
 0x3a5   :  { %v575_v14 = vpop.f32.mrf.mxu3 }
 0x3a6   :  { %v576_v15 = vadd.f32 %v1048_v26, %v575_v14 }
 0x3a8   :  { %v596_v17 = vmax.f32 %v576_v15, 0.0 }
 0x3aa   :  { %v622_v18 = vpack.c.bf16 %v596_v17, %v595_v16 }
 0x3ac   :  { %710 = vmatmul.bf16.gmra.mxu0 %v622_v18 }
 0x3ad   :  { %v578_v19 = vpop.f32.mrf.mxu3 }
 0x3ae   :  { %v579_v20 = vadd.f32 %v1048_v26, %v578_v19 }
 0x3b0   :  { %v597_v23 = vmax.f32 %v579_v20, 0.0 }
 0x3b5   :  { %v580_v21 = vpop.f32.mrf.mxu3 }
 0x3b6   :  { %v581_v22 = vadd.f32 %v1048_v26, %v580_v21 }
 0x3b8   :  { %v598_v24 = vmax.f32 %v581_v22, 0.0 }
 0x3ba   :  { %v623_v25 = vpack.c.bf16 %v598_v24, %v597_v23 }
 0x3bc   :  { %715 = vmatmul.bf16.gmra.mxu0 %v623_v25 }
 0x3c9   :  { %v681_v27 = vpop.f32.mrf.mxu0 }
 0x3d1   :  { %v683_v28 = vpop.f32.mrf.mxu0 }
 0x3d2   :  { %v721_v29 = vpack.c.bf16 %v683_v28, %v681_v27 }
 0x3d9   :  { %v686_v30 = vpop.f32.mrf.mxu0 }
 0x3e1   :  { %v688_v31 = vpop.f32.mrf.mxu0 }
 0x3e2   :  { %v722_v32 = vpack.c.bf16 %v688_v31, %v686_v30 }
 0x3e9   :  { %v691_v33 = vpop.f32.mrf.mxu0 }
 0x3f1   :  { %v693_v34 = vpop.f32.mrf.mxu0 }
 0x3f2   :  { %v723_v35 = vpack.c.bf16 %v693_v34, %v691_v33 }
 0x3f9   :  { %v696_v36 = vpop.f32.mrf.mxu0 }
 0x401   :  { %v698_v37 = vpop.f32.mrf.mxu0 }
 0x402   :  { %v724_v38 = vpack.c.bf16 %v698_v37, %v696_v36 }
 0x409   :  { %v701_v39 = vpop.f32.mrf.mxu0 }
 0x411   :  { %v703_v45 = vpop.f32.mrf.mxu0 }
 0x412   :  { %v725_v58 = vpack.c.bf16 %v703_v45, %v701_v39 }
 0x419   :  { %v706_v46 = vpop.f32.mrf.mxu0 }
 0x421   :  { %v708_v26 = vpop.f32.mrf.mxu0 }
 0x422   :  { %v726_v56 = vpack.c.bf16 %v708_v26, %v706_v46 }
 0x429   :  { %v711_v47 = vpop.f32.mrf.mxu0 }
 0x431   :  { %v713_v49 = vpop.f32.mrf.mxu0 }
 0x432   :  { %v727_v55 = vpack.c.bf16 %v713_v49, %v711_v47 }
 0x439   :  { %v716_v52 = vpop.f32.mrf.mxu0 }
 0x441   :  { %v718_v53 = vpop.f32.mrf.mxu0 }
 0x442   :  { %v728_v54 = vpack.c.bf16 %v718_v53, %v716_v52 }
 0x444   :  { %734 = vmatpush.bf16.msrb.mxu1 %v728_v54 }
 0x448   :  { %735 = vmatpush.bf16.msrb.mxu1 %v727_v55 }
 0x44c   :  { %736 = vmatpush.bf16.msrb.mxu1 %v726_v56 }
 0x450   :  { %737 = vmatpush.bf16.msrb.mxu1 %v725_v58 }
 0x454   :  { %738 = vmatpush.bf16.msrb.mxu1 %v724_v38 }
 0x458   :  { %739 = vmatpush.bf16.msrb.mxu1 %v723_v35 }
 0x45c   :  { %740 = vmatpush.bf16.msrb.mxu1 %v722_v32 }
 0x460   :  { %741 = vmatpush.bf16.msrb.mxu1 %v721_v29 }
 0x463   :  { %742 = vmatmul.bf16.vlgmr.msrb.gmra.mxu1 %v1226_v40 }
 0x473   :  { %747 = vmatmul.bf16.gmra.mxu1 %v1229_v41 }
 0x483   :  { %752 = vmatmul.bf16.gmra.mxu1 %v1235_v43 }
 0x493   :  { %757 = vmatmul.bf16.gmra.mxu1 %v1241_v48 }
 0x4a3   :  { %762 = vmatmul.bf16.gmra.mxu1 %v1232_v42 }
 0x4b3   :  { %767 = vmatmul.bf16.gmra.mxu1 %v1237_v44 }
 0x4c3   :  { %772 = vmatmul.bf16.gmra.mxu1 %v1243_v50 }
 0x4d3   :  { %777 = vmatmul.bf16.gmra.mxu1 %v1247_v51 }
 0x4e0   :  { %v743_v60 = vpop.f32.mrf.mxu1 }
 0x4e1   :  { %v744_v61 = vadd.f32 %v1049_v59, %v743_v60 }
 0x4e3   :  { %783 = vst [vmem:[#allocation10] sm:$0xff] %v744_v61 }
 0x4e8   :  { %v745_v62 = vpop.f32.mrf.mxu1 }
 0x4e9   :  { %v746_v40 = vadd.f32 %v1049_v59, %v745_v62 }
 0x4eb   :  { %784 = vst [vmem:[#allocation10 + $0x8] sm:$0xff] %v746_v40 }
 0x4f0   :  { %v748_v41 = vpop.f32.mrf.mxu1 }
 0x4f1   :  { %v749_v63 = vadd.f32 %v1049_v59, %v748_v41 }
 0x4f3   :  { %785 = vst [vmem:[#allocation10 + $0x10] sm:$0xff] %v749_v63 }
 0x4f8   :  { %v750_v43 = vpop.f32.mrf.mxu1 }
 0x4f9   :  { %v751_v48 = vadd.f32 %v1049_v59, %v750_v43 }
 0x4fb   :  { %786 = vst [vmem:[#allocation10 + $0x18] sm:$0xff] %v751_v48 }
 0x500   :  { %v753_v42 = vpop.f32.mrf.mxu1 }
 0x501   :  { %v754_v0 = vadd.f32 %v1049_v59, %v753_v42 }
 0x503   :  { %787 = vst [vmem:[#allocation10 + $0x20] sm:$0xff] %v754_v0 }
 0x508   :  { %v755_v44 = vpop.f32.mrf.mxu1 }
 0x509   :  { %v756_v50 = vadd.f32 %v1049_v59, %v755_v44 }
 0x50b   :  { %788 = vst [vmem:[#allocation10 + $0x28] sm:$0xff] %v756_v50 }
 0x510   :  { %v758_v51 = vpop.f32.mrf.mxu1 }
 0x511   :  { %v759_v1 = vadd.f32 %v1049_v59, %v758_v51 }
 0x513   :  { %789 = vst [vmem:[#allocation10 + $0x30] sm:$0xff] %v759_v1 }
 0x518   :  { %v760_v2 = vpop.f32.mrf.mxu1 }
 0x519   :  { %v761_v3 = vadd.f32 %v1049_v59, %v760_v2 }
 0x51b   :  { %790 = vst [vmem:[#allocation10 + $0x38] sm:$0xff] %v761_v3 }
 0x520   :  { %v763_v4 = vpop.f32.mrf.mxu1 }
 0x521   :  { %v764_v5 = vadd.f32 %v1049_v59, %v763_v4 }
 0x523   :  { %791 = vst [vmem:[#allocation10 + $0x40] sm:$0xff] %v764_v5 }
 0x528   :  { %v765_v6 = vpop.f32.mrf.mxu1 }
 0x529   :  { %v766_v7 = vadd.f32 %v1049_v59, %v765_v6 }
 0x52b   :  { %792 = vst [vmem:[#allocation10 + $0x48] sm:$0xff] %v766_v7 }
 0x530   :  { %v768_v8 = vpop.f32.mrf.mxu1 }
 0x531   :  { %v769_v57 = vadd.f32 %v1049_v59, %v768_v8 }
 0x533   :  { %793 = vst [vmem:[#allocation10 + $0x50] sm:$0xff] %v769_v57 }
 0x538   :  { %v770_v9 = vpop.f32.mrf.mxu1 }
 0x539   :  { %v771_v10 = vadd.f32 %v1049_v59, %v770_v9 }
 0x53b   :  { %794 = vst [vmem:[#allocation10 + $0x58] sm:$0xff] %v771_v10 }
 0x540   :  { %v773_v11 = vpop.f32.mrf.mxu1 }
 0x541   :  { %v774_v12 = vadd.f32 %v1049_v59, %v773_v11 }
 0x543   :  { %795 = vst [vmem:[#allocation10 + $0x60] sm:$0xff] %v774_v12 }
 0x548   :  { %v775_v13 = vpop.f32.mrf.mxu1 }
 0x549   :  { %v776_v14 = vadd.f32 %v1049_v59, %v775_v13 }
 0x54b   :  { %796 = vst [vmem:[#allocation10 + $0x68] sm:$0xff] %v776_v14 }
 0x550   :  { %v778_v15 = vpop.f32.mrf.mxu1 }
 0x551   :  { %v779_v16 = vadd.f32 %v1049_v59, %v778_v15 }
 0x553   :  { %797 = vst [vmem:[#allocation10 + $0x70] sm:$0xff] %v779_v16 }
 0x558   :  { %v780_v17 = vpop.f32.mrf.mxu1 }
 0x559   :  { %v781_v18 = vadd.f32 %v1049_v59, %v780_v17 }
 0x55b   :  { %798 = vst [vmem:[#allocation10 + $0x78] sm:$0xff] %v781_v18 }
 0x55c   :  { %811 = dma.vmem_to_hbm [thread:$0]  %s804_s3, 2048, %s806_s13, [#allocation4], %s1187_s14, %s1187_s14, %s1188_s15  }
 0x55d   :  { %1176 = dma.done.wait [#allocation4], 2048  }
 0x55e   :  { %1177 = vsyncadd [#allocation4], 4294965248 }
 0x55f   :  { %816 = vsyncpa [#allocation3], 1 }
 0x560   :  { %817 = vsyncpa [#allocation6], 1 }
 0x561   :  { %818 = vsyncpa [#allocation9], 1 }
 0x562   :  { %819 = vsyncpa [#allocation4], 1 }

</bundles_post_ra>
